<compile_context>
chip_gen: v7x
topology: tpu7x:2x2x1
jax: 0.10.0
libtpu: 0.0.40
codegen_flags: <defaults>
</compile_context>

<pallas_src>
import math

import jax
import jax.numpy as jnp
from jax.experimental import pallas as pl
from jax.experimental.pallas import tpu as pltpu


# ----------------------------- Pallas kernel ------------------------------ #
def _stpnn_kernel(x_ref, w1_ref, b1_ref, w2_ref, b2_ref, w3t_ref, b3_ref, o_ref):
    # x tile: (tile_n, insize).  bf16 inputs to the MXU, f32 accumulation.
    x = x_ref[...].astype(jnp.bfloat16)

    # stpnn_full0 -> ReLU -> Dropout(eval: identity)   [bias/ReLU in f32 on VPU]
    h = jnp.dot(x, w1_ref[...], preferred_element_type=jnp.float32) + b1_ref[...]
    h = jnp.maximum(h, 0.0)

    # stpnn_full1 -> ReLU -> Dropout(eval: identity)
    h = jnp.dot(h.astype(jnp.bfloat16), w2_ref[...],
                preferred_element_type=jnp.float32) + b2_ref[...]
    h = jnp.maximum(h, 0.0)

    # final full layer -> ReLU, emitted lane-dense:
    #   (outsize, h2) . (tile_n, h2)^T -> (outsize, tile_n)
    # (same contraction pattern as q @ k^T; avoids a 1-wide output column and
    #  the masked vst.msk partial stores it would force.)
    out = jax.lax.dot_general(
        w3t_ref[...], h.astype(jnp.bfloat16),
        dimension_numbers=(((1,), (1,)), ((), ())),
        preferred_element_type=jnp.float32,
    ) + b3_ref[...]
    o_ref[...] = jnp.maximum(out, 0.0)[None]        # block (1, outsize, tile_n)


# ------------------------------- Wrapper ----------------------------------- #
def _choose_tile_n(n, tile_n):
    # Lane-aligned row tiles; keep the grid >= 2 steps when n allows so both
    # v7x TensorCores get work.  128 rows (one vreg lane-width) is the floor.
    tile_n = max(128, (tile_n // 128) * 128)
    while tile_n > 128 and pl.cdiv(n, tile_n) < 2:
        tile_n //= 2
    return tile_n


def stpnn_forward(x, params, *, outsize, tile_n=1024):
    """x: (batch, height, insize) -> (batch, height * outsize), eval-mode STPNN."""
    w1, b1, w2, b2, w3, b3 = params
    batch, height, insize = x.shape
    n = batch * height
    h1 = w1.shape[1]
    h2 = w2.shape[1]

    x_flat = x.reshape(n, insize).astype(jnp.float32)   # same as torch.reshape

    tile_n = _choose_tile_n(n, tile_n)
    num_tiles = pl.cdiv(n, tile_n)
    n_pad = num_tiles * tile_n
    if n_pad != n:
        # Zero rows flow through harmlessly (biases are 0); sliced off below.
        x_flat = jnp.pad(x_flat, ((0, n_pad - n), (0, 0)))

    # bf16 weights for the MXU (tiny arrays; cast cost negligible). Biases f32.
    w1b = w1.astype(jnp.bfloat16)
    w2b = w2.astype(jnp.bfloat16)
    w3t = w3.T.astype(jnp.bfloat16)              # (outsize, h2)
    b3c = b3.reshape(outsize, 1)                 # broadcasts over lanes

    out_slab = pl.pallas_call(
        _stpnn_kernel,
        out_shape=jax.ShapeDtypeStruct((num_tiles, outsize, tile_n), jnp.float32),
        grid_spec=pltpu.PrefetchScalarGridSpec(
            num_scalar_prefetch=0,
            grid=(num_tiles,),
            in_specs=[
                pl.BlockSpec((tile_n, insize), lambda i: (i, 0)),
                pl.BlockSpec((insize, h1), lambda i: (0, 0)),
                pl.BlockSpec((1, h1), lambda i: (0, 0)),
                pl.BlockSpec((h1, h2), lambda i: (0, 0)),
                pl.BlockSpec((1, h2), lambda i: (0, 0)),
                pl.BlockSpec((outsize, h2), lambda i: (0, 0)),
                pl.BlockSpec((outsize, 1), lambda i: (0, 0)),
            ],
            out_specs=pl.BlockSpec((1, outsize, tile_n), lambda i: (i, 0, 0)),
        ),
        compiler_params=pltpu.CompilerParams(
            dimension_semantics=("parallel",),
        ),
    )(x_flat, w1b, b1, w2b, b2, w3t, b3c)

    # (num_tiles, outsize, tile_n) -> (n, outsize) -> (batch, height*outsize)
    out = out_slab.transpose(0, 2, 1).reshape(n_pad, outsize)[:n]
    return out.reshape(batch, height * outsize)


# --------------------------- Parameter creation ---------------------------- #
def _kaiming_uniform(key, fan_in, fan_out):
    # torch.nn.init.kaiming_uniform_(weight) with default args:
    # gain = sqrt(2), bound = gain * sqrt(3 / fan_in).
    # PyTorch weight is (out, in); we store it transposed as (in, out).
    bound = math.sqrt(2.0) * math.sqrt(3.0 / fan_in)
    return jax.random.uniform(
        key, (fan_in, fan_out), dtype=jnp.float32, minval=-bound, maxval=bound
    )


def init_stpnn_params(key, insize, dense_layer, outsize):
    sizes = [insize] + list(dense_layer) + [outsize]
    params = []
    for i in range(len(sizes) - 1):
        key, sub = jax.random.split(key)
        w = _kaiming_uniform(sub, sizes[i], sizes[i + 1])
        b = jnp.zeros((1, sizes[i + 1]), dtype=jnp.float32)  # bias filled with 0
        params.extend([w, b])
    return tuple(params)


# ------------------------------- References -------------------------------- #
def stpnn_reference_f32(x, params, *, outsize):
    """Pure-f32 reference (PyTorch eval-mode semantics)."""
    w1, b1, w2, b2, w3, b3 = params
    batch, height, insize = x.shape
    h = x.reshape(batch * height, insize).astype(jnp.float32)
    h = jnp.maximum(h @ w1 + b1, 0.0)
    h = jnp.maximum(h @ w2 + b2, 0.0)
    h = jnp.maximum(h @ w3 + b3, 0.0)
    return h.reshape(batch, height * outsize)


def stpnn_reference_bf16(x, params, *, outsize):
    """Numerics-matched reference: bf16 matmul inputs, f32 accumulation."""
    w1, b1, w2, b2, w3, b3 = params
    batch, height, insize = x.shape
    bf = jnp.bfloat16
    h = x.reshape(batch * height, insize).astype(jnp.float32)
    h = jnp.maximum(jnp.dot(h.astype(bf), w1.astype(bf),
                            preferred_element_type=jnp.float32) + b1, 0.0)
    h = jnp.maximum(jnp.dot(h.astype(bf), w2.astype(bf),
                            preferred_element_type=jnp.float32) + b2, 0.0)
    h = jnp.maximum(jnp.dot(h.astype(bf), w3.astype(bf),
                            preferred_element_type=jnp.float32) + b3, 0.0)
    return h.reshape(batch, height * outsize)


# ---------------------------------- Main ----------------------------------- #
if __name__ == "__main__":
    # Module config: STPNN(dense_layer=[32, 16], insize=4, outsize=1,
    #                      drop_out=0.2, batch_norm=False)  -- eval semantics.
    insize = 4
    dense_layer = [32, 16]
    outsize = 1
    batch, height = 4, 160   # n = 640 rows: exercises padding + a multi-step grid

    key = jax.random.PRNGKey(0)
    key, pkey, xkey = jax.random.split(key, 3)

    params = init_stpnn_params(pkey, insize, dense_layer, outsize)
    x = jax.random.normal(xkey, (batch, height, insize), dtype=jnp.float32)

    out = stpnn_forward(x, params, outsize=outsize, tile_n=1024)
    out = jax.block_until_ready(out)

    assert out.shape == (batch, height * outsize), out.shape

    # Primary gate: numerics-matched reference (bf16 MXU inputs, f32 accum).
    ref16 = stpnn_reference_bf16(x, params, outsize=outsize)
    err16 = float(jnp.max(jnp.abs(out - ref16)))
    assert jnp.allclose(out, ref16, atol=1e-3, rtol=1e-3), err16

    # Sanity vs. pure-f32 PyTorch semantics (loose tol covers bf16 rounding).
    ref32 = stpnn_reference_f32(x, params, outsize=outsize)
    err32 = float(jnp.max(jnp.abs(out - ref32)))
    assert jnp.allclose(out, ref32, atol=2e-1, rtol=1e-1), err32

    print("KERNEL_OK")
</pallas_src>

<mosaic_0001>
module attributes {stable_mosaic.version = 11 : i64} {
  func.func @_stpnn_kernel(%arg0: i32, %arg1: memref<512x4xf32, #tpu.memory_space<vmem>>, %arg2: memref<4x32xbf16, #tpu.memory_space<vmem>>, %arg3: memref<1x32xf32, #tpu.memory_space<vmem>>, %arg4: memref<32x16xbf16, #tpu.memory_space<vmem>>, %arg5: memref<1x16xf32, #tpu.memory_space<vmem>>, %arg6: memref<1x16xbf16, #tpu.memory_space<vmem>>, %arg7: memref<1x1xf32, #tpu.memory_space<vmem>>, %arg8: memref<1x1x512xf32, #tpu.memory_space<vmem>>) attributes {dimension_semantics = [#tpu.dimension_semantics<parallel>], iteration_bounds = array<i64: 2>, scalar_prefetch = 0 : i64, scratch_operands = 0 : i64, tpu.core_type = #tpu.core_type<tc>, window_params = [{transform_indices = @transform_0, window_bounds = array<i64: 512, 4>}, {pipeline_mode = #tpu.pipeline_mode<synchronous>, transform_indices = @transform_1, window_bounds = array<i64: 4, 32>}, {pipeline_mode = #tpu.pipeline_mode<synchronous>, transform_indices = @transform_2, window_bounds = array<i64: 1, 32>}, {pipeline_mode = #tpu.pipeline_mode<synchronous>, transform_indices = @transform_3, window_bounds = array<i64: 32, 16>}, {pipeline_mode = #tpu.pipeline_mode<synchronous>, transform_indices = @transform_4, window_bounds = array<i64: 1, 16>}, {pipeline_mode = #tpu.pipeline_mode<synchronous>, transform_indices = @transform_5, window_bounds = array<i64: 1, 16>}, {pipeline_mode = #tpu.pipeline_mode<synchronous>, transform_indices = @transform_6, window_bounds = array<i64: 1, 1>}, {transform_indices = @transform_7, window_bounds = array<i64: 1, 1, 512>}]} {
    %c0 = arith.constant 0 : index
    %c0_0 = arith.constant 0 : index
    %0 = vector.load %arg1[%c0, %c0_0] : memref<512x4xf32, #tpu.memory_space<vmem>>, vector<512x4xf32>
    %1 = arith.truncf %0 : vector<512x4xf32> to vector<512x4xbf16>
    %c0_1 = arith.constant 0 : index
    %c0_2 = arith.constant 0 : index
    %2 = vector.load %arg2[%c0_1, %c0_2] : memref<4x32xbf16, #tpu.memory_space<vmem>>, vector<4x32xbf16>
    %cst = arith.constant dense<0.000000e+00> : vector<512x32xf32>
    %3 = tpu.matmul %1, %2, %cst {dimension_numbers = #tpu.dot_dimension_numbers<[1], [0], [0], [1], [0, 0, 1, 1], [], []>} : vector<512x4xbf16>, vector<4x32xbf16>, vector<512x32xf32> -> vector<512x32xf32>
    %c0_3 = arith.constant 0 : index
    %c0_4 = arith.constant 0 : index
    %4 = vector.load %arg3[%c0_3, %c0_4] : memref<1x32xf32, #tpu.memory_space<vmem>>, vector<1x32xf32>
    %5 = vector.broadcast %4 : vector<1x32xf32> to vector<512x32xf32>
    %6 = arith.addf %3, %5 : vector<512x32xf32>
    %cst_5 = arith.constant 0.000000e+00 : f32
    %7 = vector.broadcast %cst_5 : f32 to vector<512x32xf32>
    %8 = arith.maximumf %6, %7 : vector<512x32xf32>
    %9 = arith.truncf %8 : vector<512x32xf32> to vector<512x32xbf16>
    %c0_6 = arith.constant 0 : index
    %c0_7 = arith.constant 0 : index
    %10 = vector.load %arg4[%c0_6, %c0_7] : memref<32x16xbf16, #tpu.memory_space<vmem>>, vector<32x16xbf16>
    %cst_8 = arith.constant dense<0.000000e+00> : vector<512x16xf32>
    %11 = tpu.matmul %9, %10, %cst_8 {dimension_numbers = #tpu.dot_dimension_numbers<[1], [0], [0], [1], [0, 0, 1, 1], [], []>} : vector<512x32xbf16>, vector<32x16xbf16>, vector<512x16xf32> -> vector<512x16xf32>
    %c0_9 = arith.constant 0 : index
    %c0_10 = arith.constant 0 : index
    %12 = vector.load %arg5[%c0_9, %c0_10] : memref<1x16xf32, #tpu.memory_space<vmem>>, vector<1x16xf32>
    %13 = vector.broadcast %12 : vector<1x16xf32> to vector<512x16xf32>
    %14 = arith.addf %11, %13 : vector<512x16xf32>
    %cst_11 = arith.constant 0.000000e+00 : f32
    %15 = vector.broadcast %cst_11 : f32 to vector<512x16xf32>
    %16 = arith.maximumf %14, %15 : vector<512x16xf32>
    %c0_12 = arith.constant 0 : index
    %c0_13 = arith.constant 0 : index
    %17 = vector.load %arg6[%c0_12, %c0_13] : memref<1x16xbf16, #tpu.memory_space<vmem>>, vector<1x16xbf16>
    %18 = arith.truncf %16 : vector<512x16xf32> to vector<512x16xbf16>
    %cst_14 = arith.constant dense<0.000000e+00> : vector<1x512xf32>
    %19 = tpu.matmul %17, %18, %cst_14 {dimension_numbers = #tpu.dot_dimension_numbers<[1], [1], [0], [0], [0, 0, 1, 0], [], []>} : vector<1x16xbf16>, vector<512x16xbf16>, vector<1x512xf32> -> vector<1x512xf32>
    %c0_15 = arith.constant 0 : index
    %c0_16 = arith.constant 0 : index
    %20 = vector.load %arg7[%c0_15, %c0_16] : memref<1x1xf32, #tpu.memory_space<vmem>>, vector<1x1xf32>
    %21 = vector.broadcast %20 : vector<1x1xf32> to vector<1x512xf32>
    %22 = arith.addf %19, %21 : vector<1x512xf32>
    %cst_17 = arith.constant 0.000000e+00 : f32
    %23 = vector.broadcast %cst_17 : f32 to vector<1x512xf32>
    %24 = arith.maximumf %22, %23 : vector<1x512xf32>
    %25 = vector.shape_cast %24 : vector<1x512xf32> to vector<1x1x512xf32>
    %c0_18 = arith.constant 0 : index
    %c0_19 = arith.constant 0 : index
    %c0_20 = arith.constant 0 : index
    %26 = vector.load %arg8[%c0_18, %c0_19, %c0_20] : memref<1x1x512xf32, #tpu.memory_space<vmem>>, vector<1x1x512xf32>
    tpu.vector_store %arg8[%c0_18, %c0_19, %c0_20], %25 {strides = array<i32>} : memref<1x1x512xf32, #tpu.memory_space<vmem>>, vector<1x1x512xf32>,
    return
  }
  func.func @transform_0(%arg0: i32) -> (i32, i32) {
    %c0_i32 = arith.constant 0 : i32
    %c0_i32_0 = arith.constant 0 : i32
    return %arg0, %c0_i32 : i32, i32
  }
  func.func @transform_1(%arg0: i32) -> (i32, i32) {
    %c0_i32 = arith.constant 0 : i32
    %c0_i32_0 = arith.constant 0 : i32
    %c0_i32_1 = arith.constant 0 : i32
    return %c0_i32, %c0_i32_0 : i32, i32
  }
  func.func @transform_2(%arg0: i32) -> (i32, i32) {
    %c0_i32 = arith.constant 0 : i32
    %c0_i32_0 = arith.constant 0 : i32
    %c0_i32_1 = arith.constant 0 : i32
    return %c0_i32, %c0_i32_0 : i32, i32
  }
  func.func @transform_3(%arg0: i32) -> (i32, i32) {
    %c0_i32 = arith.constant 0 : i32
    %c0_i32_0 = arith.constant 0 : i32
    %c0_i32_1 = arith.constant 0 : i32
    return %c0_i32, %c0_i32_0 : i32, i32
  }
  func.func @transform_4(%arg0: i32) -> (i32, i32) {
    %c0_i32 = arith.constant 0 : i32
    %c0_i32_0 = arith.constant 0 : i32
    %c0_i32_1 = arith.constant 0 : i32
    return %c0_i32, %c0_i32_0 : i32, i32
  }
  func.func @transform_5(%arg0: i32) -> (i32, i32) {
    %c0_i32 = arith.constant 0 : i32
    %c0_i32_0 = arith.constant 0 : i32
    %c0_i32_1 = arith.constant 0 : i32
    return %c0_i32, %c0_i32_0 : i32, i32
  }
  func.func @transform_6(%arg0: i32) -> (i32, i32) {
    %c0_i32 = arith.constant 0 : i32
    %c0_i32_0 = arith.constant 0 : i32
    %c0_i32_1 = arith.constant 0 : i32
    return %c0_i32, %c0_i32_0 : i32, i32
  }
  func.func @transform_7(%arg0: i32) -> (i32, i32, i32) {
    %c0_i32 = arith.constant 0 : i32
    %c0_i32_0 = arith.constant 0 : i32
    %c0_i32_1 = arith.constant 0 : i32
    return %arg0, %c0_i32, %c0_i32_0 : i32, i32, i32
  }
}

</mosaic_0001>

<bundles_post_ra>
// kernel: tpu_custom_call.1
= control target key start
LH: loop header
LB: loop body
LE: loop exit
PB: predicated region body
PF: predicated region fallthrough
CT: control target
= control target key end

     0   :  { %s2645_s0 = inlined_call_operand.vmem [shape: f32[1024,4], index: 0, kind: input, shape index: {}]   ;;  %s2646_s1 = inlined_call_operand.vmem [shape: bf16[4,32], index: 1, kind: input, shape index: {}]   ;;  %s2647_s2 = inlined_call_operand.vmem [shape: f32[1,32], index: 2, kind: input, shape index: {}]   ;;  %s2648_s3 = inlined_call_operand.vmem [shape: bf16[32,16], index: 3, kind: input, shape index: {}]   ;;  %s2649_s4 = inlined_call_operand.vmem [shape: f32[1,16], index: 4, kind: input, shape index: {}]   ;;  %s2650_s5 = inlined_call_operand.vmem [shape: bf16[1,16], index: 5, kind: input, shape index: {}]   ;;  %s2651_s6 = inlined_call_operand.<no memory space> [shape: f32[1,1], index: 6, kind: input, shape index: {}]   ;;  %s2652_s7 = inlined_call_operand.hbm [shape: f32[2,1,512], index: 7, kind: output, shape index: {}]  }
   0x1   :  { %v12_v0 = vstv %s2651_s6 }
   0x2   :  { %13 = vst [vmem:[#allocation2] sm:$0x1] %v12_v0 }
   0x3   :  { %14 = vsyncpa [#allocation4], 0 }
   0x4   :  { %16 = vsyncpa [#allocation4 + $0x1], 0  ;;  %s2173_s26 = smov 0   ;;  %s2175_s27 = smov 0  }
   0x5   :  { %s2177_s28 = smov 0   ;;  %s2179_s29 = smov 0  }
   0x6 LB: > { %s1681_s6 = sadd.s32 4294967295, %s2125_s29   ;;  %s1682_s30 = sadd.s32 4294967294, %s2125_s29   ;;  %s2125_s29 = sphi %s2179_s29, %s2658_s29   ;;  %s2121_s28 = sphi %s2177_s28, %s2657_s28   ;;  %s2117_s27 = sphi %s2175_s27, %s2656_s27   ;;  %s2113_s26 = sphi %s2173_s26, %s2655_s26  }
   0x7   : > { %s2196_s8 = sadd.s32 1, %s2125_s29   ;;  %s181_s9 = sadd.s32 1, %s2121_s28 }
   0x8   : > { %s178_s10 = ssub.s32 %s2125_s29, %s2196_s8  ;;  %p191_p0 = scmp.ne.s32.totalorder %s2121_s28, %s2117_s27 }
   0x9   : > { %p179_p1 = scmp.eq.s32.totalorder %s178_s10, 0  ;;  %p192_p2 = scmp.eq.s32.totalorder %s1681_s6, 1 }
   0xa   : > { %p197_p3 = scmp.ne.s32.totalorder %s2117_s27, %s2113_s26  ;;  %p198_p4 = scmp.eq.s32.totalorder %s1682_s30, 1 }
   0xb   : > { %s2206_s11 = scalar_select %p179_p1, %s2121_s28, %s181_s9  }
   0xc   : > { %p2208_p5 = por %p192_p2, %p191_p0  ;;  %p2212_p6 = por %p198_p4, %p197_p3 }
   0xd   : > { %p1685_p7 = scmp.ge.s32.totalorder %s2125_s29, 1  ;;  %p243_p8 = scmp.lt.s32.totalorder %s2125_s29, 3 }
   0xf   : > { %p244_p9 = pnand %p1685_p7, %p243_p8 }
  0x10   : > { %v378_v1 = vld [vmem:[%s2646_s1] sm:$0x3] (!%p244_p9)  ;;  %vm483_vm0 = vcmask (!%p244_p9), 1041408   ;;  %s2221_s16 = sshll.u32 (!%p244_p9), %s1681_s6, 6  ;;  %vm386_vm1 = vcmask (!%p244_p9), 31744   ;;  %vm895_vm2 = vcmask (!%p244_p9), 261120  }
  0x11   : > { %247 = sbr.rel (%p244_p9) target bundleno = 874 (0x36a), region = 48  ;;  %2002 = vmatprep.subr.msk.bf16.mxu0 (!%p244_p9), %vm483_vm0, %v378_v1  ;;  %v485_v2 = vsel (!%p244_p9), %vm483_vm0, %v378_v1, 0  ;;  %p276_p10 = scmp.lt.s32.totalorder (!%p244_p9), %s2221_s16, 127  ;;  %vm1388_vm3 = vcmask (!%p244_p9), 130048  }
  0x12   : > { %1869 = vmatpush3.bf16.msra.mxu0 (!%p244_p9), %v485_v2  ;;  %s2603_s23 = scalar_lea.hbm (!%p244_p9), %s2652_s7, %s2221_s16  ;;  %s2129_s6 = smov (!%p244_p9), [#allocation3]  }
  0x13   : > { %s2067_s30 = sshll.u32 (!%p244_p9), %s2129_s6, 4  ;;  %s2068_s30 = int_to_ptr.vmem [resolvable:$false] %s2067_s30 }
  0x14   : > { %s2069_s9 = scalar_lea.vmem (!%p244_p9), %s2068_s30, 128 }
  0x18   : > { %s277_s17 = scalar_select %p276_p10, %s2221_s16, 127 }
  0x1a   : > { %s1688_s18 = sshll.u32 %s277_s17, 3  ;;  %s272_s17 = sand.u32 1, %s2117_s27  }
  0x1b   : > { %s2228_s21 = scalar_lea.vmem %s2645_s0, %s1688_s18  ;;  %s1686_s18 = sshll.u32 %s272_s17, 2 }
  0x1c   : > { %v282_v3 = vld [vmem:[%s2228_s21] sm:$0xff]  ;;  %v283_v4 = vld [vmem:[%s2228_s21 + $0x8] sm:$0xff]  ;;  %v284_v5 = vld [vmem:[%s2228_s21 + $0x10] sm:$0xff]  ;;  %s274_s19 = scalar_lea.vmem [#allocation3], %s1686_s18  ;;  %s1609_s24 = scalar_lea.sflag [#allocation4], %s272_s17 }
  0x1d   : > { %v346_v6 = vpack.c.bf16 %v283_v4, %v282_v3  ;;  %v285_v7 = vld [vmem:[%s2228_s21 + $0x18] sm:$0xff]  ;;  %v286_v8 = vld [vmem:[%s2228_s21 + $0x20] sm:$0xff]  ;;  %v287_v9 = vld [vmem:[%s2228_s21 + $0x28] sm:$0xff]  ;;  %s1623_s20 = sshll.u32 %s274_s19, 4  ;;  %s2605_s20 = int_to_ptr.vmem [resolvable:$true] %s1623_s20 }
  0x1e   : > { %v347_v10 = vpack.c.bf16 %v285_v7, %v284_v5  ;;  %v348_v11 = vpack.c.bf16 %v287_v9, %v286_v8  ;;  %v288_v12 = vld [vmem:[%s2228_s21 + $0x30] sm:$0xff]  ;;  %v289_v13 = vld [vmem:[%s2228_s21 + $0x38] sm:$0xff]  ;;  %v290_v14 = vld [vmem:[%s2228_s21 + $0x40] sm:$0xff]  ;;  %s2063_s25 = scalar_lea.vmem %s2605_s20, 64  ;;  %p2070_p0 = scmp.lt.s32.totalorder %s2605_s20, %s2068_s30 }
  0x1f   : > { %1870 = vmatprep.mubr.msk.bf16.mxu0 %vm386_vm1, %v346_v6  ;;  %v291_v15 = vld [vmem:[%s2228_s21 + $0x48] sm:$0xff]  ;;  %v349_v16 = vpack.c.bf16 %v289_v13, %v288_v12  ;;  %v292_v18 = vld [vmem:[%s2228_s21 + $0x50] sm:$0xff]  ;;  %v293_v19 = vld [vmem:[%s2228_s21 + $0x58] sm:$0xff]  ;;  %p2064_p11 = scmp.ne.s32.totalorder %s2605_s20, %s2063_s25  ;;  %p2071_p1 = scmp.lt.s32.totalorder %s2069_s9, %s2063_s25 }
  0x20   : > { %1871 = vmatmul.mubr.msk.bf16.vlgmr.msra.gmra.mrb[0].mxu0 %vm386_vm1, %v347_v10  ;;  %v350_v17 = vpack.c.bf16 %v291_v15, %v290_v14  ;;  %v294_v20 = vld [vmem:[%s2228_s21 + $0x60] sm:$0xff]  ;;  %v295_v21 = vld [vmem:[%s2228_s21 + $0x68] sm:$0xff]  ;;  %v351_v22 = vpack.c.bf16 %v293_v19, %v292_v18  ;;  %v296_v24 = vld [vmem:[%s2228_s21 + $0x70] sm:$0xff] }
  0x21   : > { %1874 = vmatprep.mubr.msk.bf16.mxu0 %vm386_vm1, %v348_v11  ;;  %v352_v23 = vpack.c.bf16 %v295_v21, %v294_v20  ;;  %v297_v25 = vld [vmem:[%s2228_s21 + $0x78] sm:$0xff]  ;;  %v298_v26 = vld [vmem:[%s2228_s21 + $0x80] sm:$0xff]  ;;  %v299_v27 = vld [vmem:[%s2228_s21 + $0x88] sm:$0xff]  ;;  %p2065_p12 = pnand %p2064_p11, %p2208_p5  ;;  %p2072_p2 = por %p2071_p1, %p2070_p0 }
  0x22   : > { %v353_v28 = vpack.c.bf16 %v297_v25, %v296_v24  ;;  %v354_v29 = vpack.c.bf16 %v299_v27, %v298_v26  ;;  %v300_v30 = vld [vmem:[%s2228_s21 + $0x90] sm:$0xff]  ;;  %v301_v31 = vld [vmem:[%s2228_s21 + $0x98] sm:$0xff]  ;;  %v302_v32 = vld [vmem:[%s2228_s21 + $0xa0] sm:$0xff] }
  0x23   : > { %v303_v33 = vld [vmem:[%s2228_s21 + $0xa8] sm:$0xff]  ;;  %v355_v34 = vpack.c.bf16 %v301_v31, %v300_v30  ;;  %v304_v36 = vld [vmem:[%s2228_s21 + $0xb0] sm:$0xff]  ;;  %v305_v37 = vld [vmem:[%s2228_s21 + $0xb8] sm:$0xff]  ;;  %p2066_p13 = pneg %p2065_p12 }
  0x24   : > { %v356_v35 = vpack.c.bf16 %v303_v33, %v302_v32  ;;  %v306_v38 = vld [vmem:[%s2228_s21 + $0xc0] sm:$0xff]  ;;  %v307_v39 = vld [vmem:[%s2228_s21 + $0xc8] sm:$0xff]  ;;  %v357_v40 = vpack.c.bf16 %v305_v37, %v304_v36  ;;  %v308_v42 = vld [vmem:[%s2228_s21 + $0xd0] sm:$0xff] }
  0x25   : > { %v358_v41 = vpack.c.bf16 %v307_v39, %v306_v38  ;;  %v309_v43 = vld [vmem:[%s2228_s21 + $0xd8] sm:$0xff]  ;;  %v310_v44 = vld [vmem:[%s2228_s21 + $0xe0] sm:$0xff]  ;;  %v311_v45 = vld [vmem:[%s2228_s21 + $0xe8] sm:$0xff]  ;;  %p2073_p3 = pnand %p2072_p2, %p2066_p13 }
  0x26   : > { %v359_v46 = vpack.c.bf16 %v309_v43, %v308_v42  ;;  %v360_v47 = vpack.c.bf16 %v311_v45, %v310_v44  ;;  %v312_v48 = vld [vmem:[%s2228_s21 + $0xf0] sm:$0xff]  ;;  %v313_v49 = vld [vmem:[%s2228_s21 + $0xf8] sm:$0xff]  ;;  %v314_v50 = vld [vmem:[%s2228_s21 + $0x100] sm:$0xff] }
  0x27   : > { %v315_v51 = vld [vmem:[%s2228_s21 + $0x108] sm:$0xff]  ;;  %v361_v52 = vpack.c.bf16 %v313_v49, %v312_v48  ;;  %v316_v54 = vld [vmem:[%s2228_s21 + $0x110] sm:$0xff]  ;;  %v317_v55 = vld [vmem:[%s2228_s21 + $0x118] sm:$0xff] }
  0x28   : > { %1875 = vmatmul.mubr.msk.bf16.gmra.mrb[4].mxu0 %vm386_vm1, %v349_v16  ;;  %v362_v53 = vpack.c.bf16 %v315_v51, %v314_v50  ;;  %v318_v56 = vld [vmem:[%s2228_s21 + $0x120] sm:$0xff]  ;;  %v319_v57 = vld [vmem:[%s2228_s21 + $0x128] sm:$0xff]  ;;  %v363_v58 = vpack.c.bf16 %v317_v55, %v316_v54  ;;  %v320_v60 = vld [vmem:[%s2228_s21 + $0x130] sm:$0xff] }
  0x29   : > { %1878 = vmatprep.mubr.msk.bf16.mxu0 %vm386_vm1, %v350_v17  ;;  %v364_v59 = vpack.c.bf16 %v319_v57, %v318_v56  ;;  %v321_v61 = vld [vmem:[%s2228_s21 + $0x138] sm:$0xff]  ;;  %v322_v62 = vld [vmem:[%s2228_s21 + $0x140] sm:$0xff]  ;;  %v323_v63 = vld [vmem:[%s2228_s21 + $0x148] sm:$0xff] }
  0x2a   : > { %v365_v0 = vpack.c.bf16 %v321_v61, %v320_v60  ;;  %v366_v1 = vpack.c.bf16 %v323_v63, %v322_v62  ;;  %v324_v2 = vld [vmem:[%s2228_s21 + $0x150] sm:$0xff]  ;;  %v325_v3 = vld [vmem:[%s2228_s21 + $0x158] sm:$0xff]  ;;  %v326_v4 = vld [vmem:[%s2228_s21 + $0x160] sm:$0xff] }
  0x2b   : > { %v327_v5 = vld [vmem:[%s2228_s21 + $0x168] sm:$0xff]  ;;  %v367_v6 = vpack.c.bf16 %v325_v3, %v324_v2  ;;  %v328_v8 = vld [vmem:[%s2228_s21 + $0x170] sm:$0xff]  ;;  %v329_v9 = vld [vmem:[%s2228_s21 + $0x178] sm:$0xff] }
  0x2c   : > { %v368_v7 = vpack.c.bf16 %v327_v5, %v326_v4  ;;  %v330_v10 = vld [vmem:[%s2228_s21 + $0x180] sm:$0xff]  ;;  %v331_v11 = vld [vmem:[%s2228_s21 + $0x188] sm:$0xff]  ;;  %v369_v12 = vpack.c.bf16 %v329_v9, %v328_v8  ;;  %v332_v16 = vld [vmem:[%s2228_s21 + $0x190] sm:$0xff] }
  0x2d   : > { %v2061_v13 = vld [vmem:[%s2648_s3] sm:$0xff]   ;;  %v370_v14 = vpack.c.bf16 %v331_v11, %v330_v10  ;;  %v2062_v15 = vld [vmem:[%s2648_s3 + $0x8] sm:$0xff]   ;;  %v333_v17 = vld [vmem:[%s2228_s21 + $0x198] sm:$0xff] }
  0x2e   : > { %1934 = vmatprep.subr.bf16.mxu1 %v2061_v13  ;;  %v334_v18 = vld [vmem:[%s2228_s21 + $0x1a0] sm:$0xff]  ;;  %v335_v19 = vld [vmem:[%s2228_s21 + $0x1a8] sm:$0xff]  ;;  %v371_v20 = vpack.c.bf16 %v333_v17, %v332_v16 }
  0x2f   : > { %1935 = vmatpush3.bf16.msra.mxu1 %v2061_v13  ;;  %v372_v21 = vpack.c.bf16 %v335_v19, %v334_v18  ;;  %v338_v24 = vld [vmem:[%s2228_s21 + $0x1c0] sm:$0xff]  ;;  %v339_v25 = vld [vmem:[%s2228_s21 + $0x1c8] sm:$0xff] }
  0x30   : > { %1879 = vmatmul.mubr.msk.bf16.gmra.mrb[8].mxu0 %vm386_vm1, %v351_v22  ;;  %1936 = vmatprep.subr.bf16.mxu1 %v2062_v15  ;;  %v336_v22 = vld [vmem:[%s2228_s21 + $0x1b0] sm:$0xff]  ;;  %v374_v27 = vpack.c.bf16 %v339_v25, %v338_v24  ;;  %v342_v30 = vld [vmem:[%s2228_s21 + $0x1e0] sm:$0xff]  ;;  %v343_v31 = vld [vmem:[%s2228_s21 + $0x1e8] sm:$0xff] }
  0x31   : > { %1882 = vmatprep.mubr.msk.bf16.mxu0 %vm386_vm1, %v352_v23  ;;  %v337_v23 = vld [vmem:[%s2228_s21 + $0x1b8] sm:$0xff]  ;;  %v376_v33 = vpack.c.bf16 %v343_v31, %v342_v30  ;;  %v2335_v37 = vld [vmem:[%s2647_s2] ss:$0 sm:$0xff] }
  0x32   : > { %v373_v26 = vpack.c.bf16 %v337_v23, %v336_v22 }
  0x33   : > { %1937 = vmatpush3.bf16.msra.mxu1 %v2062_v15 }
  0x38   : > { %1883 = vmatmul.mubr.msk.bf16.gmra.mrb[12].mxu0 %vm386_vm1, %v353_v28  ;;  %v340_v28 = vld [vmem:[%s2228_s21 + $0x1d0] sm:$0xff] }
  0x39   : > { %1886 = vmatprep.mubr.msk.bf16.mxu0 %vm386_vm1, %v354_v29  ;;  %v341_v29 = vld [vmem:[%s2228_s21 + $0x1d8] sm:$0xff] }
  0x3a   : > { %v375_v32 = vpack.c.bf16 %v341_v29, %v340_v28 }
  0x40   : > { %1887 = vmatmul.mubr.msk.bf16.gmra.mrb[16].mxu0 %vm386_vm1, %v355_v34  ;;  %v344_v34 = vld [vmem:[%s2228_s21 + $0x1f0] sm:$0xff] }
  0x41   : > { %1890 = vmatprep.mubr.msk.bf16.mxu0 %vm386_vm1, %v356_v35  ;;  %v345_v35 = vld [vmem:[%s2228_s21 + $0x1f8] sm:$0xff] }
  0x42   : > { %v377_v36 = vpack.c.bf16 %v345_v35, %v344_v34 }
  0x48   : > { %1891 = vmatmul.mubr.msk.bf16.gmra.mrb[20].mxu0 %vm386_vm1, %v357_v40 }
  0x49   : > { %1894 = vmatprep.mubr.msk.bf16.mxu0 %vm386_vm1, %v358_v41 }
  0x50   : > { %1895 = vmatmul.mubr.msk.bf16.gmra.mrb[24].mxu0 %vm386_vm1, %v359_v46 }
  0x51   : > { %1898 = vmatprep.mubr.msk.bf16.mxu0 %vm386_vm1, %v360_v47 }
  0x58   : > { %1899 = vmatmul.mubr.msk.bf16.gmra.mrb[28].mxu0 %vm386_vm1, %v361_v52 }
  0x59   : > { %1902 = vmatprep.mubr.msk.bf16.mxu0 %vm386_vm1, %v362_v53 }
  0x60   : > { %1903 = vmatmul.mubr.msk.bf16.gmra.mrb[32].mxu0 %vm386_vm1, %v363_v58 }
  0x61   : > { %1906 = vmatprep.mubr.msk.bf16.mxu0 %vm386_vm1, %v364_v59 }
  0x68   : > { %1907 = vmatmul.mubr.msk.bf16.gmra.mrb[36].mxu0 %vm386_vm1, %v365_v0 }
  0x69   : > { %1910 = vmatprep.mubr.msk.bf16.mxu0 %vm386_vm1, %v366_v1 }
  0x70   : > { %1911 = vmatmul.mubr.msk.bf16.gmra.mrb[40].mxu0 %vm386_vm1, %v367_v6 }
  0x71   : > { %1914 = vmatprep.mubr.msk.bf16.mxu0 %vm386_vm1, %v368_v7 }
  0x78   : > { %1915 = vmatmul.mubr.msk.bf16.gmra.mrb[44].mxu0 %vm386_vm1, %v369_v12 }
  0x79   : > { %1918 = vmatprep.mubr.msk.bf16.mxu0 %vm386_vm1, %v370_v14 }
  0x80   : > { %1919 = vmatmul.mubr.msk.bf16.gmra.mrb[48].mxu0 %vm386_vm1, %v371_v20 }
  0x81   : > { %1922 = vmatprep.mubr.msk.bf16.mxu0 %vm386_vm1, %v372_v21 }
  0x88   : > { %1923 = vmatmul.mubr.msk.bf16.gmra.mrb[52].mxu0 %vm386_vm1, %v373_v26 }
  0x89   : > { %1926 = vmatprep.mubr.msk.bf16.mxu0 %vm386_vm1, %v374_v27 }
  0x90   : > { %1927 = vmatmul.mubr.msk.bf16.gmra.mrb[56].mxu0 %vm386_vm1, %v375_v32 }
  0x91   : > { %1930 = vmatprep.mubr.msk.bf16.mxu0 %vm386_vm1, %v376_v33 }
  0x98   : > { %1931 = vmatmul.mubr.msk.bf16.gmra.mrb[60].mxu0 %vm386_vm1, %v377_v36 }
  0xf3   : > { %v1872_v38 = vpop.f32.mrb[0].mxu0 }
  0xf4   : > { %v530_v39 = vadd.f32 %v1872_v38, %v2335_v37  ;;  %v521_v40 = vpop.f32.mrb[1].mxu0 }
  0xf5   : > { %v522_v41 = vadd.f32 %v2335_v37, %v521_v40  ;;  %v1873_v42 = vpop.f32.mrb[2].mxu0 }
  0xf6   : > { %v533_v43 = vadd.f32 %v1873_v42, %v2335_v37  ;;  %v524_v44 = vpop.f32.mrb[3].mxu0  ;;  %v778_v46 = vmax.f32 %v530_v39, 0.0 }
  0xf7   : > { %v525_v45 = vadd.f32 %v2335_v37, %v524_v44  ;;  %v776_v48 = vmax.f32 %v522_v41, 0.0 }
  0xf8   : > { %v779_v47 = vmax.f32 %v533_v43, 0.0 }
  0xf9   : > { %v777_v49 = vmax.f32 %v525_v45, 0.0 }
  0xfa   : > { %v841_v50 = vpack.c.bf16 %v779_v47, %v778_v46 }
  0xfb   : > { %v1876_v51 = vpop.f32.mrb[4].mxu0  ;;  %v840_v52 = vpack.c.bf16 %v777_v49, %v776_v48 }
  0xfc   : > { %v546_v53 = vadd.f32 %v1876_v51, %v2335_v37  ;;  %v537_v54 = vpop.f32.mrb[5].mxu0 }
  0xfd   : > { %v538_v55 = vadd.f32 %v2335_v37, %v537_v54  ;;  %v1877_v56 = vpop.f32.mrb[6].mxu0  ;;  %1938 = vmatprep.mubr.msk.bf16.mxu1 %vm895_vm2, %v840_v52 }
  0xfe   : > { %v549_v57 = vadd.f32 %v1877_v56, %v2335_v37  ;;  %v540_v58 = vpop.f32.mrb[7].mxu0  ;;  %1939 = vmatmul.mubr.msk.bf16.vlgmr.msra.gmra.mrb[0].mxu1 %vm895_vm2, %v841_v50  ;;  %v782_v60 = vmax.f32 %v546_v53, 0.0 }
  0xff   : > { %v541_v59 = vadd.f32 %v2335_v37, %v540_v58  ;;  %v780_v62 = vmax.f32 %v538_v55, 0.0 }
 0x100   : > { %v783_v61 = vmax.f32 %v549_v57, 0.0 }
 0x101   : > { %v781_v63 = vmax.f32 %v541_v59, 0.0 }
 0x102   : > { %v843_v0 = vpack.c.bf16 %v783_v61, %v782_v60 }
 0x103   : > { %v842_v1 = vpack.c.bf16 %v781_v63, %v780_v62  ;;  %v1880_v2 = vpop.f32.mrb[8].mxu0 }
 0x104   : > { %v562_v3 = vadd.f32 %v1880_v2, %v2335_v37  ;;  %v553_v4 = vpop.f32.mrb[9].mxu0 }
 0x105   : > { %v554_v5 = vadd.f32 %v2335_v37, %v553_v4  ;;  %v1881_v6 = vpop.f32.mrb[10].mxu0  ;;  %1942 = vmatprep.mubr.msk.bf16.mxu1 %vm895_vm2, %v842_v1 }
 0x106   : > { %v565_v7 = vadd.f32 %v1881_v6, %v2335_v37  ;;  %v556_v8 = vpop.f32.mrb[11].mxu0  ;;  %1943 = vmatmul.mubr.msk.bf16.gmra.mrb[4].mxu1 %vm895_vm2, %v843_v0  ;;  %v786_v10 = vmax.f32 %v562_v3, 0.0 }
 0x107   : > { %v557_v9 = vadd.f32 %v2335_v37, %v556_v8  ;;  %v784_v12 = vmax.f32 %v554_v5, 0.0 }
 0x108   : > { %v787_v11 = vmax.f32 %v565_v7, 0.0 }
 0x109   : > { %v785_v13 = vmax.f32 %v557_v9, 0.0 }
 0x10a   : > { %v845_v14 = vpack.c.bf16 %v787_v11, %v786_v10 }
 0x10b   : > { %v844_v15 = vpack.c.bf16 %v785_v13, %v784_v12  ;;  %v1884_v16 = vpop.f32.mrb[12].mxu0 }
 0x10c   : > { %v578_v17 = vadd.f32 %v1884_v16, %v2335_v37  ;;  %v569_v18 = vpop.f32.mrb[13].mxu0 }
 0x10d   : > { %v570_v19 = vadd.f32 %v2335_v37, %v569_v18  ;;  %v1885_v20 = vpop.f32.mrb[14].mxu0  ;;  %1946 = vmatprep.mubr.msk.bf16.mxu1 %vm895_vm2, %v844_v15 }
 0x10e   : > { %v581_v21 = vadd.f32 %v1885_v20, %v2335_v37  ;;  %v572_v22 = vpop.f32.mrb[15].mxu0  ;;  %1947 = vmatmul.mubr.msk.bf16.gmra.mrb[8].mxu1 %vm895_vm2, %v845_v14  ;;  %v790_v24 = vmax.f32 %v578_v17, 0.0 }
 0x10f   : > { %v573_v23 = vadd.f32 %v2335_v37, %v572_v22  ;;  %v788_v26 = vmax.f32 %v570_v19, 0.0 }
 0x110   : > { %v791_v25 = vmax.f32 %v581_v21, 0.0 }
 0x111   : > { %v789_v27 = vmax.f32 %v573_v23, 0.0 }
 0x112   : > { %v847_v28 = vpack.c.bf16 %v791_v25, %v790_v24 }
 0x113   : > { %v846_v29 = vpack.c.bf16 %v789_v27, %v788_v26  ;;  %v1888_v30 = vpop.f32.mrb[16].mxu0 }
 0x114   : > { %v594_v31 = vadd.f32 %v1888_v30, %v2335_v37  ;;  %v585_v32 = vpop.f32.mrb[17].mxu0 }
 0x115   : > { %v586_v33 = vadd.f32 %v2335_v37, %v585_v32  ;;  %v1889_v34 = vpop.f32.mrb[18].mxu0  ;;  %1950 = vmatprep.mubr.msk.bf16.mxu1 %vm895_vm2, %v846_v29 }
 0x116   : > { %v597_v35 = vadd.f32 %v1889_v34, %v2335_v37  ;;  %v588_v36 = vpop.f32.mrb[19].mxu0  ;;  %1951 = vmatmul.mubr.msk.bf16.gmra.mrb[12].mxu1 %vm895_vm2, %v847_v28  ;;  %v794_v39 = vmax.f32 %v594_v31, 0.0 }
 0x117   : > { %v589_v38 = vadd.f32 %v2335_v37, %v588_v36  ;;  %v792_v41 = vmax.f32 %v586_v33, 0.0 }
 0x118   : > { %v795_v40 = vmax.f32 %v597_v35, 0.0 }
 0x119   : > { %v793_v42 = vmax.f32 %v589_v38, 0.0 }
 0x11a   : > { %v849_v43 = vpack.c.bf16 %v795_v40, %v794_v39 }
 0x11b   : > { %v848_v44 = vpack.c.bf16 %v793_v42, %v792_v41  ;;  %v1892_v45 = vpop.f32.mrb[20].mxu0 }
 0x11c   : > { %v610_v46 = vadd.f32 %v1892_v45, %v2335_v37  ;;  %v601_v47 = vpop.f32.mrb[21].mxu0 }
 0x11d   : > { %v602_v48 = vadd.f32 %v2335_v37, %v601_v47  ;;  %v1893_v49 = vpop.f32.mrb[22].mxu0  ;;  %1954 = vmatprep.mubr.msk.bf16.mxu1 %vm895_vm2, %v848_v44 }
 0x11e   : > { %v613_v50 = vadd.f32 %v1893_v49, %v2335_v37  ;;  %v604_v51 = vpop.f32.mrb[23].mxu0  ;;  %1955 = vmatmul.mubr.msk.bf16.gmra.mrb[16].mxu1 %vm895_vm2, %v849_v43  ;;  %v798_v53 = vmax.f32 %v610_v46, 0.0 }
 0x11f   : > { %v605_v52 = vadd.f32 %v2335_v37, %v604_v51  ;;  %v796_v55 = vmax.f32 %v602_v48, 0.0 }
 0x120   : > { %v799_v54 = vmax.f32 %v613_v50, 0.0 }
 0x121   : > { %v797_v56 = vmax.f32 %v605_v52, 0.0 }
 0x122   : > { %v851_v57 = vpack.c.bf16 %v799_v54, %v798_v53 }
 0x123   : > { %v850_v58 = vpack.c.bf16 %v797_v56, %v796_v55  ;;  %v1896_v59 = vpop.f32.mrb[24].mxu0 }
 0x124   : > { %v626_v60 = vadd.f32 %v1896_v59, %v2335_v37  ;;  %v617_v61 = vpop.f32.mrb[25].mxu0 }
 0x125   : > { %v618_v62 = vadd.f32 %v2335_v37, %v617_v61  ;;  %v1897_v63 = vpop.f32.mrb[26].mxu0  ;;  %1958 = vmatprep.mubr.msk.bf16.mxu1 %vm895_vm2, %v850_v58 }
 0x126   : > { %v629_v0 = vadd.f32 %v1897_v63, %v2335_v37  ;;  %v620_v1 = vpop.f32.mrb[27].mxu0  ;;  %1959 = vmatmul.mubr.msk.bf16.gmra.mrb[20].mxu1 %vm895_vm2, %v851_v57  ;;  %v802_v3 = vmax.f32 %v626_v60, 0.0 }
 0x127   : > { %v621_v2 = vadd.f32 %v2335_v37, %v620_v1  ;;  %v800_v5 = vmax.f32 %v618_v62, 0.0 }
 0x128   : > { %v803_v4 = vmax.f32 %v629_v0, 0.0 }
 0x129   : > { %v801_v6 = vmax.f32 %v621_v2, 0.0 }
 0x12a   : > { %v853_v7 = vpack.c.bf16 %v803_v4, %v802_v3 }
 0x12b   : > { %v852_v8 = vpack.c.bf16 %v801_v6, %v800_v5  ;;  %v1900_v9 = vpop.f32.mrb[28].mxu0 }
 0x12c   : > { %v642_v10 = vadd.f32 %v1900_v9, %v2335_v37  ;;  %v633_v11 = vpop.f32.mrb[29].mxu0 }
 0x12d   : > { %v634_v12 = vadd.f32 %v2335_v37, %v633_v11  ;;  %v1901_v13 = vpop.f32.mrb[30].mxu0  ;;  %1962 = vmatprep.mubr.msk.bf16.mxu1 %vm895_vm2, %v852_v8 }
 0x12e   : > { %v645_v14 = vadd.f32 %v1901_v13, %v2335_v37  ;;  %v636_v15 = vpop.f32.mrb[31].mxu0  ;;  %1963 = vmatmul.mubr.msk.bf16.gmra.mrb[24].mxu1 %vm895_vm2, %v853_v7  ;;  %v806_v17 = vmax.f32 %v642_v10, 0.0 }
 0x12f   : > { %v637_v16 = vadd.f32 %v2335_v37, %v636_v15  ;;  %v804_v19 = vmax.f32 %v634_v12, 0.0 }
 0x130   : > { %v807_v18 = vmax.f32 %v645_v14, 0.0 }
 0x131   : > { %v805_v20 = vmax.f32 %v637_v16, 0.0 }
 0x132   : > { %v855_v21 = vpack.c.bf16 %v807_v18, %v806_v17 }
 0x133   : > { %v854_v22 = vpack.c.bf16 %v805_v20, %v804_v19  ;;  %v1904_v23 = vpop.f32.mrb[32].mxu0 }
 0x134   : > { %v658_v24 = vadd.f32 %v1904_v23, %v2335_v37  ;;  %v649_v25 = vpop.f32.mrb[33].mxu0 }
 0x135   : > { %v650_v26 = vadd.f32 %v2335_v37, %v649_v25  ;;  %v1905_v27 = vpop.f32.mrb[34].mxu0  ;;  %1966 = vmatprep.mubr.msk.bf16.mxu1 %vm895_vm2, %v854_v22 }
 0x136   : > { %v661_v28 = vadd.f32 %v1905_v27, %v2335_v37  ;;  %v652_v29 = vpop.f32.mrb[35].mxu0  ;;  %1967 = vmatmul.mubr.msk.bf16.gmra.mrb[28].mxu1 %vm895_vm2, %v855_v21  ;;  %v810_v31 = vmax.f32 %v658_v24, 0.0 }
 0x137   : > { %v653_v30 = vadd.f32 %v2335_v37, %v652_v29  ;;  %v808_v33 = vmax.f32 %v650_v26, 0.0 }
 0x138   : > { %v811_v32 = vmax.f32 %v661_v28, 0.0 }
 0x139   : > { %v809_v34 = vmax.f32 %v653_v30, 0.0 }
 0x13a   : > { %v857_v35 = vpack.c.bf16 %v811_v32, %v810_v31 }
 0x13b   : > { %v856_v36 = vpack.c.bf16 %v809_v34, %v808_v33  ;;  %v1908_v38 = vpop.f32.mrb[36].mxu0 }
 0x13c   : > { %v674_v39 = vadd.f32 %v1908_v38, %v2335_v37  ;;  %v665_v40 = vpop.f32.mrb[37].mxu0 }
 0x13d   : > { %v666_v41 = vadd.f32 %v2335_v37, %v665_v40  ;;  %v1909_v42 = vpop.f32.mrb[38].mxu0  ;;  %1970 = vmatprep.mubr.msk.bf16.mxu1 %vm895_vm2, %v856_v36 }
 0x13e   : > { %v677_v43 = vadd.f32 %v1909_v42, %v2335_v37  ;;  %v668_v44 = vpop.f32.mrb[39].mxu0  ;;  %1971 = vmatmul.mubr.msk.bf16.gmra.mrb[32].mxu1 %vm895_vm2, %v857_v35  ;;  %v814_v46 = vmax.f32 %v674_v39, 0.0 }
 0x13f   : > { %v669_v45 = vadd.f32 %v2335_v37, %v668_v44  ;;  %v812_v48 = vmax.f32 %v666_v41, 0.0 }
 0x140   : > { %v815_v47 = vmax.f32 %v677_v43, 0.0 }
 0x141   : > { %v813_v49 = vmax.f32 %v669_v45, 0.0 }
 0x142   : > { %v859_v50 = vpack.c.bf16 %v815_v47, %v814_v46 }
 0x143   : > { %v858_v51 = vpack.c.bf16 %v813_v49, %v812_v48  ;;  %v1912_v52 = vpop.f32.mrb[40].mxu0 }
 0x144   : > { %v690_v53 = vadd.f32 %v1912_v52, %v2335_v37  ;;  %v681_v54 = vpop.f32.mrb[41].mxu0 }
 0x145   : > { %v682_v55 = vadd.f32 %v2335_v37, %v681_v54  ;;  %v1913_v56 = vpop.f32.mrb[42].mxu0  ;;  %1974 = vmatprep.mubr.msk.bf16.mxu1 %vm895_vm2, %v858_v51 }
 0x146   : > { %v693_v57 = vadd.f32 %v1913_v56, %v2335_v37  ;;  %v684_v58 = vpop.f32.mrb[43].mxu0  ;;  %1975 = vmatmul.mubr.msk.bf16.gmra.mrb[36].mxu1 %vm895_vm2, %v859_v50  ;;  %v818_v60 = vmax.f32 %v690_v53, 0.0 }
 0x147   : > { %v685_v59 = vadd.f32 %v2335_v37, %v684_v58  ;;  %v816_v62 = vmax.f32 %v682_v55, 0.0 }
 0x148   : > { %v819_v61 = vmax.f32 %v693_v57, 0.0 }
 0x149   : > { %v817_v63 = vmax.f32 %v685_v59, 0.0 }
 0x14a   : > { %v861_v0 = vpack.c.bf16 %v819_v61, %v818_v60 }
 0x14b   : > { %v860_v1 = vpack.c.bf16 %v817_v63, %v816_v62  ;;  %v1916_v2 = vpop.f32.mrb[44].mxu0 }
 0x14c   : > { %v706_v3 = vadd.f32 %v1916_v2, %v2335_v37  ;;  %v697_v4 = vpop.f32.mrb[45].mxu0 }
 0x14d   : > { %v698_v5 = vadd.f32 %v2335_v37, %v697_v4  ;;  %v1917_v6 = vpop.f32.mrb[46].mxu0  ;;  %1978 = vmatprep.mubr.msk.bf16.mxu1 %vm895_vm2, %v860_v1 }
 0x14e   : > { %v709_v7 = vadd.f32 %v1917_v6, %v2335_v37  ;;  %v700_v8 = vpop.f32.mrb[47].mxu0  ;;  %1979 = vmatmul.mubr.msk.bf16.gmra.mrb[40].mxu1 %vm895_vm2, %v861_v0  ;;  %v822_v10 = vmax.f32 %v706_v3, 0.0 }
 0x14f   : > { %v701_v9 = vadd.f32 %v2335_v37, %v700_v8  ;;  %v820_v12 = vmax.f32 %v698_v5, 0.0 }
 0x150   : > { %v823_v11 = vmax.f32 %v709_v7, 0.0 }
 0x151   : > { %v821_v13 = vmax.f32 %v701_v9, 0.0  ;;  %v2436_v9 = vld [vmem:[%s2649_s4] ss:$0 sm:$0xff] }
 0x152   : > { %v863_v14 = vpack.c.bf16 %v823_v11, %v822_v10 }
 0x153   : > { %v862_v15 = vpack.c.bf16 %v821_v13, %v820_v12  ;;  %v1920_v16 = vpop.f32.mrb[48].mxu0 }
 0x154   : > { %v722_v17 = vadd.f32 %v1920_v16, %v2335_v37  ;;  %v713_v18 = vpop.f32.mrb[49].mxu0 }
 0x155   : > { %v714_v19 = vadd.f32 %v2335_v37, %v713_v18  ;;  %v1921_v20 = vpop.f32.mrb[50].mxu0  ;;  %1982 = vmatprep.mubr.msk.bf16.mxu1 %vm895_vm2, %v862_v15 }
 0x156   : > { %v725_v21 = vadd.f32 %v1921_v20, %v2335_v37  ;;  %v716_v22 = vpop.f32.mrb[51].mxu0  ;;  %1983 = vmatmul.mubr.msk.bf16.gmra.mrb[44].mxu1 %vm895_vm2, %v863_v14  ;;  %v826_v24 = vmax.f32 %v722_v17, 0.0 }
 0x157   : > { %v717_v23 = vadd.f32 %v2335_v37, %v716_v22  ;;  %v824_v26 = vmax.f32 %v714_v19, 0.0 }
 0x158   : > { %v827_v25 = vmax.f32 %v725_v21, 0.0 }
 0x159   : > { %v825_v27 = vmax.f32 %v717_v23, 0.0 }
 0x15a   : > { %v865_v28 = vpack.c.bf16 %v827_v25, %v826_v24 }
 0x15b   : > { %v864_v29 = vpack.c.bf16 %v825_v27, %v824_v26  ;;  %v1924_v30 = vpop.f32.mrb[52].mxu0 }
 0x15c   : > { %v738_v31 = vadd.f32 %v1924_v30, %v2335_v37  ;;  %v729_v32 = vpop.f32.mrb[53].mxu0 }
 0x15d   : > { %1986 = vmatprep.mubr.msk.bf16.mxu1 %vm895_vm2, %v864_v29  ;;  %v730_v33 = vadd.f32 %v2335_v37, %v729_v32  ;;  %v1925_v34 = vpop.f32.mrb[54].mxu0 }
 0x15e   : > { %1987 = vmatmul.mubr.msk.bf16.gmra.mrb[48].mxu1 %vm895_vm2, %v865_v28  ;;  %v830_v35 = vmax.f32 %v738_v31, 0.0  ;;  %v741_v36 = vadd.f32 %v1925_v34, %v2335_v37  ;;  %v732_v38 = vpop.f32.mrb[55].mxu0 }
 0x15f   : > { %v828_v39 = vmax.f32 %v730_v33, 0.0  ;;  %v733_v40 = vadd.f32 %v2335_v37, %v732_v38 }
 0x160   : > { %v831_v41 = vmax.f32 %v741_v36, 0.0 }
 0x161   : > { %v829_v42 = vmax.f32 %v733_v40, 0.0 }
 0x162   : > { %v867_v43 = vpack.c.bf16 %v831_v41, %v830_v35 }
 0x163   : > { %v866_v44 = vpack.c.bf16 %v829_v42, %v828_v39  ;;  %v1928_v45 = vpop.f32.mrb[56].mxu0 }
 0x164   : > { %v754_v46 = vadd.f32 %v1928_v45, %v2335_v37  ;;  %v745_v47 = vpop.f32.mrb[57].mxu0 }
 0x165   : > { %1990 = vmatprep.mubr.msk.bf16.mxu1 %vm895_vm2, %v866_v44  ;;  %v746_v48 = vadd.f32 %v2335_v37, %v745_v47  ;;  %v1929_v49 = vpop.f32.mrb[58].mxu0 }
 0x166   : > { %1991 = vmatmul.mubr.msk.bf16.gmra.mrb[52].mxu1 %vm895_vm2, %v867_v43  ;;  %v834_v50 = vmax.f32 %v754_v46, 0.0  ;;  %v757_v51 = vadd.f32 %v1929_v49, %v2335_v37  ;;  %v748_v52 = vpop.f32.mrb[59].mxu0 }
 0x167   : > { %v832_v53 = vmax.f32 %v746_v48, 0.0  ;;  %v749_v54 = vadd.f32 %v2335_v37, %v748_v52 }
 0x168   : > { %v835_v55 = vmax.f32 %v757_v51, 0.0 }
 0x169   : > { %v833_v56 = vmax.f32 %v749_v54, 0.0 }
 0x16a   : > { %v869_v57 = vpack.c.bf16 %v835_v55, %v834_v50 }
 0x16b   : > { %v868_v58 = vpack.c.bf16 %v833_v56, %v832_v53  ;;  %v1932_v59 = vpop.f32.mrb[60].mxu0 }
 0x16c   : > { %v770_v60 = vadd.f32 %v1932_v59, %v2335_v37  ;;  %v761_v61 = vpop.f32.mrb[61].mxu0 }
 0x16d   : > { %1994 = vmatprep.mubr.msk.bf16.mxu1 %vm895_vm2, %v868_v58  ;;  %v762_v62 = vadd.f32 %v2335_v37, %v761_v61  ;;  %v1933_v63 = vpop.f32.mrb[62].mxu0 }
 0x16e   : > { %1995 = vmatmul.mubr.msk.bf16.gmra.mrb[56].mxu1 %vm895_vm2, %v869_v57  ;;  %v838_v0 = vmax.f32 %v770_v60, 0.0  ;;  %v773_v1 = vadd.f32 %v1933_v63, %v2335_v37  ;;  %v764_v2 = vpop.f32.mrb[63].mxu0 }
 0x16f   : > { %v836_v3 = vmax.f32 %v762_v62, 0.0  ;;  %v765_v4 = vadd.f32 %v2335_v37, %v764_v2 }
 0x170   : > { %v839_v5 = vmax.f32 %v773_v1, 0.0 }
 0x171   : > { %v837_v6 = vmax.f32 %v765_v4, 0.0 }
 0x172   : > { %v871_v7 = vpack.c.bf16 %v839_v5, %v838_v0 }
 0x173   : > { %v870_v8 = vpack.c.bf16 %v837_v6, %v836_v3 }
 0x175   : > { %1998 = vmatprep.mubr.msk.bf16.mxu1 %vm895_vm2, %v870_v8 }
 0x176   : > { %1999 = vmatmul.mubr.msk.bf16.gmra.mrb[60].mxu1 %vm895_vm2, %v871_v7 }
 0x1d1   : > { %v1940_v10 = vpop.f32.mrb[0].mxu1 }
 0x1d2   : > { %v1035_v11 = vadd.f32 %v1940_v10, %v2436_v9  ;;  %v1026_v12 = vpop.f32.mrb[1].mxu1  ;;  %v2476_v10 = vld [vmem:[%s2650_s5] sm:$0x1] }
 0x1d3   : > { %v1027_v13 = vadd.f32 %v2436_v9, %v1026_v12  ;;  %v1941_v37 = vpop.f32.mrb[2].mxu1  ;;  %1848 = vmatprep.mubr.msk.bf16.mxu0 %vm1388_vm3, %v2476_v10  ;;  %1866 = vmatprep.mubr.msk.bf16.mxu1 %vm1388_vm3, %v2476_v10 }
 0x1d4   : > { %v1038_v14 = vadd.f32 %v1941_v37, %v2436_v9  ;;  %v1029_v15 = vpop.f32.mrb[3].mxu1  ;;  %v1283_v17 = vmax.f32 %v1035_v11, 0.0 }
 0x1d5   : > { %v1030_v16 = vadd.f32 %v2436_v9, %v1029_v15  ;;  %v1281_v19 = vmax.f32 %v1027_v13, 0.0 }
 0x1d6   : > { %v1284_v18 = vmax.f32 %v1038_v14, 0.0 }
 0x1d7   : > { %v1282_v20 = vmax.f32 %v1030_v16, 0.0 }
 0x1d8   : > { %v2442_v21 = vpack.c.bf16 %v1284_v18, %v1283_v17 }
 0x1d9   : > { %v2444_v22 = vpack.c.bf16 %v1282_v20, %v1281_v19  ;;  %v1944_v23 = vpop.f32.mrb[4].mxu1 }
 0x1da   : > { %v1051_v24 = vadd.f32 %v1944_v23, %v2436_v9  ;;  %v1042_v25 = vpop.f32.mrb[5].mxu1 }
 0x1db   : > { %v1043_v26 = vadd.f32 %v2436_v9, %v1042_v25  ;;  %v1945_v27 = vpop.f32.mrb[6].mxu1  ;;  %v1378_v25 = vld [vmem:[#allocation2] sm:$0x1] }
 0x1dc   : > { %v1054_v28 = vadd.f32 %v1945_v27, %v2436_v9  ;;  %v1045_v29 = vpop.f32.mrb[7].mxu1  ;;  %v1287_v31 = vmax.f32 %v1051_v24, 0.0  ;;  %v1393_v24 = vsel %vm1388_vm3, %v2444_v22, 0 }
 0x1dd   : > { %v1046_v30 = vadd.f32 %v2436_v9, %v1045_v29  ;;  %v1285_v33 = vmax.f32 %v1043_v26, 0.0 }
 0x1de   : > { %v1288_v32 = vmax.f32 %v1054_v28, 0.0  ;;  %v2127_v28 = vmov 0  }
 0x1df   : > { %v1286_v34 = vmax.f32 %v1046_v30, 0.0  ;;  %2060 = vset.pattern.permute.xlu0 %v2127_v28 }
 0x1e0   : > { %v2450_v35 = vpack.c.bf16 %v1288_v32, %v1287_v31  ;;  %1381 = vperm.xlu0 %2060, %v1378_v25  }
 0x1e1   : > { %v2452_v36 = vpack.c.bf16 %v1286_v34, %v1285_v33  ;;  %v1948_v38 = vpop.f32.mrb[8].mxu1 }
 0x1e2   : > { %v1067_v39 = vadd.f32 %v1948_v38, %v2436_v9  ;;  %v1058_v40 = vpop.f32.mrb[9].mxu1 }
 0x1e3   : > { %v1059_v41 = vadd.f32 %v2436_v9, %v1058_v40  ;;  %v1949_v42 = vpop.f32.mrb[10].mxu1 }
 0x1e4   : > { %v1070_v43 = vadd.f32 %v1949_v42, %v2436_v9  ;;  %v1061_v44 = vpop.f32.mrb[11].mxu1  ;;  %v1291_v46 = vmax.f32 %v1067_v39, 0.0 }
 0x1e5   : > { %v1062_v45 = vadd.f32 %v2436_v9, %v1061_v44  ;;  %v1289_v48 = vmax.f32 %v1059_v41, 0.0 }
 0x1e6   : > { %v1292_v47 = vmax.f32 %v1070_v43, 0.0  ;;  %v1396_v43 = vsel %vm1388_vm3, %v2442_v21, 0 }
 0x1e7   : > { %v1290_v49 = vmax.f32 %v1062_v45, 0.0 }
 0x1e8   : > { %v2458_v50 = vpack.c.bf16 %v1292_v47, %v1291_v46 }
 0x1e9   : > { %v2460_v51 = vpack.c.bf16 %v1290_v49, %v1289_v48  ;;  %v1952_v52 = vpop.f32.mrb[12].mxu1 }
 0x1ea   : > { %v1083_v53 = vadd.f32 %v1952_v52, %v2436_v9  ;;  %v1074_v54 = vpop.f32.mrb[13].mxu1 }
 0x1eb   : > { %v1075_v55 = vadd.f32 %v2436_v9, %v1074_v54  ;;  %v1953_v56 = vpop.f32.mrb[14].mxu1  ;;  %v1405_v28 = vsel %vm1388_vm3, %v2460_v51, 0 }
 0x1ec   : > { %v1086_v57 = vadd.f32 %v1953_v56, %v2436_v9  ;;  %v1077_v58 = vpop.f32.mrb[15].mxu1  ;;  %v1295_v60 = vmax.f32 %v1083_v53, 0.0 }
 0x1ed   : > { %v1078_v59 = vadd.f32 %v2436_v9, %v1077_v58  ;;  %v1293_v62 = vmax.f32 %v1075_v55, 0.0 }
 0x1ee   : > { %v1296_v61 = vmax.f32 %v1086_v57, 0.0 }
 0x1ef   : > { %v1294_v63 = vmax.f32 %v1078_v59, 0.0  ;;  %v1399_v59 = vsel %vm1388_vm3, %v2452_v36, 0 }
 0x1f0   : > { %v2466_v0 = vpack.c.bf16 %v1296_v61, %v1295_v60 }
 0x1f1   : > { %v2468_v1 = vpack.c.bf16 %v1294_v63, %v1293_v62  ;;  %v1956_v2 = vpop.f32.mrb[16].mxu1 }
 0x1f2   : > { %v1099_v3 = vadd.f32 %v1956_v2, %v2436_v9  ;;  %v1090_v4 = vpop.f32.mrb[17].mxu1 }
 0x1f3   : > { %v1091_v5 = vadd.f32 %v2436_v9, %v1090_v4  ;;  %v1957_v6 = vpop.f32.mrb[18].mxu1 }
 0x1f4   : > { %v1102_v7 = vadd.f32 %v1957_v6, %v2436_v9  ;;  %v1093_v8 = vpop.f32.mrb[19].mxu1  ;;  %v1299_v12 = vmax.f32 %v1099_v3, 0.0 }
 0x1f5   : > { %v1094_v11 = vadd.f32 %v2436_v9, %v1093_v8  ;;  %v1297_v37 = vmax.f32 %v1091_v5, 0.0 }
 0x1f6   : > { %v1300_v13 = vmax.f32 %v1102_v7, 0.0 }
 0x1f7   : > { %v1298_v14 = vmax.f32 %v1094_v11, 0.0 }
 0x1f8   : > { %v1355_v15 = vpack.c.bf16 %v1300_v13, %v1299_v12  ;;  %v1402_v13 = vsel %vm1388_vm3, %v2450_v35, 0 }
 0x1f9   : > { %v1354_v16 = vpack.c.bf16 %v1298_v14, %v1297_v37  ;;  %v1960_v17 = vpop.f32.mrb[20].mxu1 }
 0x1fa   : > { %v1115_v18 = vadd.f32 %v1960_v17, %v2436_v9  ;;  %v1106_v19 = vpop.f32.mrb[21].mxu1 }
 0x1fb   : > { %v1107_v20 = vadd.f32 %v2436_v9, %v1106_v19  ;;  %v1961_v23 = vpop.f32.mrb[22].mxu1  ;;  %2003 = vmatprep.subr.msk.bf16.mxu0 %vm1388_vm3, %v1354_v16 }
 0x1fc   : > { %v1118_v26 = vadd.f32 %v1961_v23, %v2436_v9  ;;  %v1109_v27 = vpop.f32.mrb[23].mxu1  ;;  %1833 = vmatpush3.bf16.xpose.msra.mxu0 %v1393_v24  ;;  %v1303_v30 = vmax.f32 %v1115_v18, 0.0 }
 0x1fd   : > { %v1110_v29 = vadd.f32 %v2436_v9, %v1109_v27  ;;  %2004 = vmatprep.subr.msk.bf16.mxu0 %vm1388_vm3, %v1355_v15  ;;  %v1301_v32 = vmax.f32 %v1107_v20, 0.0 }
 0x1fe   : > { %v1304_v31 = vmax.f32 %v1118_v26, 0.0 }
 0x1ff   : > { %v1302_v33 = vmax.f32 %v1110_v29, 0.0 }
 0x200   : > { %v1357_v34 = vpack.c.bf16 %v1304_v31, %v1303_v30 }
 0x201   : > { %v1356_v38 = vpack.c.bf16 %v1302_v33, %v1301_v32  ;;  %v1964_v39 = vpop.f32.mrb[24].mxu1 }
 0x202   : > { %v1131_v22 = vadd.f32 %v1964_v39, %v2436_v9  ;;  %v1122_v40 = vpop.f32.mrb[25].mxu1 }
 0x203   : > { %v1123_v41 = vadd.f32 %v2436_v9, %v1122_v40  ;;  %v1965_v42 = vpop.f32.mrb[26].mxu1 }
 0x204   : > { %v1134_v44 = vadd.f32 %v1965_v42, %v2436_v9  ;;  %v1125_v45 = vpop.f32.mrb[27].mxu1  ;;  %1835 = vmatpush3.bf16.xpose.msra.mxu0 %v1396_v43  ;;  %v1307_v47 = vmax.f32 %v1131_v22, 0.0 }
 0x205   : > { %v1126_v46 = vadd.f32 %v2436_v9, %v1125_v45  ;;  %2005 = vmatprep.subr.msk.bf16.mxu0 %vm1388_vm3, %v1356_v38  ;;  %v1305_v49 = vmax.f32 %v1123_v41, 0.0 }
 0x206   : > { %v1308_v48 = vmax.f32 %v1134_v44, 0.0  ;;  %v1408_v44 = vsel %vm1388_vm3, %v2458_v50, 0 }
 0x207   : > { %v1306_v52 = vmax.f32 %v1126_v46, 0.0 }
 0x208   : > { %v1359_v53 = vpack.c.bf16 %v1308_v48, %v1307_v47 }
 0x209   : > { %v1358_v54 = vpack.c.bf16 %v1306_v52, %v1305_v49  ;;  %v1968_v55 = vpop.f32.mrb[28].mxu1 }
 0x20a   : > { %v1147_v56 = vadd.f32 %v1968_v55, %v2436_v9  ;;  %v1138_v57 = vpop.f32.mrb[29].mxu1 }
 0x20b   : > { %v1139_v21 = vadd.f32 %v2436_v9, %v1138_v57  ;;  %v1969_v58 = vpop.f32.mrb[30].mxu1 }
 0x20c   : > { %v1150_v60 = vadd.f32 %v1969_v58, %v2436_v9  ;;  %v1141_v61 = vpop.f32.mrb[31].mxu1  ;;  %1837 = vmatpush3.bf16.xpose.msra.mxu0 %v1399_v59  ;;  %v1311_v63 = vmax.f32 %v1147_v56, 0.0  ;;  %v1411_v59 = vsel %vm1388_vm3, %v2468_v1, 0 }
 0x20d   : > { %v1142_v62 = vadd.f32 %v2436_v9, %v1141_v61  ;;  %2006 = vmatprep.subr.msk.bf16.mxu0 %vm1388_vm3, %v1357_v34  ;;  %v1309_v3 = vmax.f32 %v1139_v21, 0.0 }
 0x20e   : > { %v1312_v2 = vmax.f32 %v1150_v60, 0.0 }
 0x20f   : > { %v1310_v4 = vmax.f32 %v1142_v62, 0.0 }
 0x210   : > { %v2505_v5 = vpack.c.bf16 %v1312_v2, %v1311_v63 }
 0x211   : > { %v1360_v6 = vpack.c.bf16 %v1310_v4, %v1309_v3  ;;  %v1972_v7 = vpop.f32.mrb[32].mxu1 }
 0x212   : > { %v1163_v8 = vadd.f32 %v1972_v7, %v2436_v9  ;;  %v1154_v11 = vpop.f32.mrb[33].mxu1 }
 0x213   : > { %v1155_v36 = vadd.f32 %v2436_v9, %v1154_v11  ;;  %v1973_v12 = vpop.f32.mrb[34].mxu1 }
 0x214   : > { %v1166_v37 = vadd.f32 %v1973_v12, %v2436_v9  ;;  %v1157_v14 = vpop.f32.mrb[35].mxu1  ;;  %1839 = vmatpush3.bf16.xpose.msra.mxu0 %v1402_v13  ;;  %v1315_v16 = vmax.f32 %v1163_v8, 0.0  ;;  %v1414_v13 = vsel %vm1388_vm3, %v2466_v0, 0 }
 0x215   : > { %v1158_v15 = vadd.f32 %v2436_v9, %v1157_v14  ;;  %2007 = vmatprep.subr.msk.bf16.mxu0 %vm1388_vm3, %v1358_v54  ;;  %v1313_v18 = vmax.f32 %v1155_v36, 0.0 }
 0x216   : > { %v1316_v17 = vmax.f32 %v1166_v37, 0.0 }
 0x217   : > { %v1314_v19 = vmax.f32 %v1158_v15, 0.0 }
 0x218   : > { %v2514_v20 = vpack.c.bf16 %v1316_v17, %v1315_v16 }
 0x219   : > { %v2516_v23 = vpack.c.bf16 %v1314_v19, %v1313_v18  ;;  %v1976_v24 = vpop.f32.mrb[36].mxu1 }
 0x21a   : > { %v1179_v25 = vadd.f32 %v1976_v24, %v2436_v9  ;;  %v1170_v35 = vpop.f32.mrb[37].mxu1 }
 0x21b   : > { %v1171_v26 = vadd.f32 %v2436_v9, %v1170_v35  ;;  %v1977_v27 = vpop.f32.mrb[38].mxu1  ;;  %v1441_v0 = vsel %vm1388_vm3, %v2516_v23, 0 }
 0x21c   : > { %v1182_v29 = vadd.f32 %v1977_v27, %v2436_v9  ;;  %v1173_v30 = vpop.f32.mrb[39].mxu1  ;;  %1841 = vmatpush3.bf16.xpose.msra.mxu0 %v1405_v28  ;;  %v1319_v32 = vmax.f32 %v1179_v25, 0.0 }
 0x21d   : > { %v1174_v31 = vadd.f32 %v2436_v9, %v1173_v30  ;;  %2008 = vmatprep.subr.msk.bf16.mxu0 %vm1388_vm3, %v1359_v53  ;;  %v1317_v34 = vmax.f32 %v1171_v26, 0.0 }
 0x21e   : > { %v1320_v33 = vmax.f32 %v1182_v29, 0.0 }
 0x21f   : > { %v1318_v38 = vmax.f32 %v1174_v31, 0.0 }
 0x220   : > { %v2525_v39 = vpack.c.bf16 %v1320_v33, %v1319_v32 }
 0x221   : > { %v2527_v22 = vpack.c.bf16 %v1318_v38, %v1317_v34  ;;  %v1980_v40 = vpop.f32.mrb[40].mxu1 }
 0x222   : > { %v1195_v41 = vadd.f32 %v1980_v40, %v2436_v9  ;;  %v1186_v51 = vpop.f32.mrb[41].mxu1 }
 0x223   : > { %v1187_v42 = vadd.f32 %v2436_v9, %v1186_v51  ;;  %v1981_v43 = vpop.f32.mrb[42].mxu1 }
 0x224   : > { %v1198_v45 = vadd.f32 %v1981_v43, %v2436_v9  ;;  %v1189_v46 = vpop.f32.mrb[43].mxu1  ;;  %1843 = vmatpush3.bf16.xpose.msra.mxu0 %v1408_v44  ;;  %v1323_v48 = vmax.f32 %v1195_v41, 0.0  ;;  %v1444_v43 = vsel %vm1388_vm3, %v2514_v20, 0 }
 0x225   : > { %v1190_v47 = vadd.f32 %v2436_v9, %v1189_v46  ;;  %2009 = vmatprep.subr.msk.bf16.mxu0 %vm1388_vm3, %v1360_v6  ;;  %v1321_v52 = vmax.f32 %v1187_v42, 0.0 }
 0x226   : > { %v1324_v49 = vmax.f32 %v1198_v45, 0.0 }
 0x227   : > { %v1322_v53 = vmax.f32 %v1190_v47, 0.0 }
 0x228   : > { %v2536_v54 = vpack.c.bf16 %v1324_v49, %v1323_v48 }
 0x229   : > { %v2538_v55 = vpack.c.bf16 %v1322_v53, %v1321_v52  ;;  %v1984_v56 = vpop.f32.mrb[44].mxu1 }
 0x22a   : > { %v1211_v57 = vadd.f32 %v1984_v56, %v2436_v9  ;;  %v1202_v50 = vpop.f32.mrb[45].mxu1 }
 0x22b   : > { %v1203_v21 = vadd.f32 %v2436_v9, %v1202_v50  ;;  %v1985_v58 = vpop.f32.mrb[46].mxu1 }
 0x22c   : > { %v1214_v60 = vadd.f32 %v1985_v58, %v2436_v9  ;;  %v1205_v61 = vpop.f32.mrb[47].mxu1  ;;  %1845 = vmatpush3.bf16.xpose.msra.mxu0 %v1411_v59  ;;  %v1327_v63 = vmax.f32 %v1211_v57, 0.0  ;;  %v1447_v59 = vsel %vm1388_vm3, %v2527_v22, 0  ;;  %v1450_v22 = vsel %vm1388_vm3, %v2525_v39, 0 }
 0x22d   : > { %v1206_v62 = vadd.f32 %v2436_v9, %v1205_v61  ;;  %2010 = vmatprep.subr.msk.bf16.mxu0 %vm1388_vm3, %v2505_v5  ;;  %v1325_v3 = vmax.f32 %v1203_v21, 0.0 }
 0x22e   : > { %v1328_v2 = vmax.f32 %v1214_v60, 0.0 }
 0x22f   : > { %v1326_v4 = vmax.f32 %v1206_v62, 0.0 }
 0x230   : > { %v2548_v6 = vpack.c.bf16 %v1328_v2, %v1327_v63 }
 0x231   : > { %v2550_v7 = vpack.c.bf16 %v1326_v4, %v1325_v3  ;;  %v1988_v8 = vpop.f32.mrb[48].mxu1 }
 0x232   : > { %v1227_v1 = vadd.f32 %v1988_v8, %v2436_v9  ;;  %v1218_v11 = vpop.f32.mrb[49].mxu1  ;;  %v1462_v39 = vsel %vm1388_vm3, %v2548_v6, 0  ;;  %v2128_v6 = vmov 1966171168  }
 0x233   : > { %v1219_v36 = vadd.f32 %v2436_v9, %v1218_v11  ;;  %v1989_v12 = vpop.f32.mrb[50].mxu1 }
 0x234   : > { %v1230_v5 = vadd.f32 %v1989_v12, %v2436_v9  ;;  %v1221_v37 = vpop.f32.mrb[51].mxu1  ;;  %1847 = vmatpush3.bf16.xpose.msra.mxu0 %v1414_v13  ;;  %v1331_v15 = vmax.f32 %v1227_v1, 0.0  ;;  %v1453_v12 = vsel %vm1388_vm3, %v2538_v55, 0  ;;  %v1456_v13 = vsel %vm1388_vm3, %v2536_v54, 0 }
 0x235   : > { %v1222_v14 = vadd.f32 %v2436_v9, %v1221_v37  ;;  %v1329_v17 = vmax.f32 %v1219_v36, 0.0  ;;  %v1384_v55 = vlaneseq }
 0x236   : > { %v1332_v16 = vmax.f32 %v1230_v5, 0.0 }
 0x237   : > { %v1330_v18 = vmax.f32 %v1222_v14, 0.0  ;;  %v1385_v5 = vshrl.u32 %v1384_v55, 7  ;;  %vm1605_vm4 = vcmp.lt.s32.totalorder %v1384_v55, 512 }
 0x238   : > { %v1371_v19 = vpack.c.bf16 %v1332_v16, %v1331_v15 }
 0x239   : > { %v1370_v24 = vpack.c.bf16 %v1330_v18, %v1329_v17  ;;  %v1992_v25 = vpop.f32.mrb[52].mxu1  ;;  %v1386_v37 = vsub.s32 0, %v1385_v5 }
 0x23a   : > { %v1243_v35 = vadd.f32 %v1992_v25, %v2436_v9  ;;  %v1234_v26 = vpop.f32.mrb[53].mxu1 }
 0x23b   : > { %2011 = vmatprep.subr.msk.bf16.mxu1 %vm1388_vm3, %v1370_v24  ;;  %v1235_v27 = vadd.f32 %v2436_v9, %v1234_v26  ;;  %v1993_v28 = vpop.f32.mrb[54].mxu1  ;;  %1849 = vmatmul.mubr.msk.bf16.vlgmr.msra.gmra.mrb[64].mxu0 %vm1388_vm3, %v2476_v10  ;;  %v1581_v26 = vunpack.c.l.s4 %v2128_v6 }
 0x23c   : > { %1851 = vmatpush3.bf16.xpose.msra.mxu1 %v1441_v0  ;;  %v1335_v29 = vmax.f32 %v1243_v35, 0.0  ;;  %v1246_v30 = vadd.f32 %v1993_v28, %v2436_v9  ;;  %v1237_v31 = vpop.f32.mrb[55].mxu1 }
 0x23d   : > { %2012 = vmatprep.subr.msk.bf16.mxu1 %vm1388_vm3, %v1371_v19  ;;  %v1333_v32 = vmax.f32 %v1235_v27, 0.0  ;;  %v1238_v33 = vadd.f32 %v2436_v9, %v1237_v31  ;;  %v1582_v0 = vunpack.c.0.s8 %v1581_v26 }
 0x23e   : > { %v1336_v34 = vmax.f32 %v1246_v30, 0.0 }
 0x23f   : > { %v1334_v38 = vmax.f32 %v1238_v33, 0.0 }
 0x240   : > { %v1373_v40 = vpack.c.bf16 %v1336_v34, %v1335_v29  ;;  %v1585_v29 = vsub.s32 %v1582_v0, %v1385_v5 }
 0x241   : > { %v1372_v23 = vpack.c.bf16 %v1334_v38, %v1333_v32  ;;  %v1996_v41 = vpop.f32.mrb[56].mxu1 }
 0x242   : > { %v1259_v51 = vadd.f32 %v1996_v41, %v2436_v9  ;;  %v1250_v42 = vpop.f32.mrb[57].mxu1 }
 0x243   : > { %v1251_v44 = vadd.f32 %v2436_v9, %v1250_v42  ;;  %v1997_v45 = vpop.f32.mrb[58].mxu1 }
 0x244   : > { %1853 = vmatpush3.bf16.xpose.msra.mxu1 %v1444_v43  ;;  %v1339_v46 = vmax.f32 %v1259_v51, 0.0  ;;  %v1262_v47 = vadd.f32 %v1997_v45, %v2436_v9  ;;  %v1253_v48 = vpop.f32.mrb[59].mxu1 }
 0x245   : > { %2013 = vmatprep.subr.msk.bf16.mxu1 %vm1388_vm3, %v1372_v23  ;;  %v1337_v49 = vmax.f32 %v1251_v44, 0.0  ;;  %v1254_v52 = vadd.f32 %v2436_v9, %v1253_v48 }
 0x246   : > { %v1340_v53 = vmax.f32 %v1262_v47, 0.0 }
 0x247   : > { %v1338_v56 = vmax.f32 %v1254_v52, 0.0 }
 0x248   : > { %v1375_v57 = vpack.c.bf16 %v1340_v53, %v1339_v46 }
 0x249   : > { %v1374_v50 = vpack.c.bf16 %v1338_v56, %v1337_v49  ;;  %v2000_v21 = vpop.f32.mrb[60].mxu1 }
 0x24a   : > { %v1275_v20 = vadd.f32 %v2000_v21, %v2436_v9  ;;  %v1266_v58 = vpop.f32.mrb[61].mxu1 }
 0x24b   : > { %v1267_v60 = vadd.f32 %v2436_v9, %v1266_v58  ;;  %v2001_v61 = vpop.f32.mrb[62].mxu1 }
 0x24c   : > { %1855 = vmatpush3.bf16.xpose.msra.mxu1 %v1447_v59  ;;  %v1343_v62 = vmax.f32 %v1275_v20, 0.0  ;;  %v1278_v63 = vadd.f32 %v2001_v61, %v2436_v9  ;;  %v1269_v2 = vpop.f32.mrb[63].mxu1 }
 0x24d   : > { %2014 = vmatprep.subr.msk.bf16.mxu1 %vm1388_vm3, %v1373_v40  ;;  %v1341_v3 = vmax.f32 %v1267_v60, 0.0  ;;  %v1270_v4 = vadd.f32 %v2436_v9, %v1269_v2  ;;  %v1459_v9 = vsel %vm1388_vm3, %v2550_v7, 0 }
 0x24e   : > { %v1344_v8 = vmax.f32 %v1278_v63, 0.0 }
 0x24f   : > { %v1342_v1 = vmax.f32 %v1270_v4, 0.0 }
 0x250   : > { %v1377_v11 = vpack.c.bf16 %v1344_v8, %v1343_v62 }
 0x251   : > { %v1376_v36 = vpack.c.bf16 %v1342_v1, %v1341_v3 }
 0x254   : > { %1857 = vmatpush3.bf16.xpose.msra.mxu1 %v1450_v22 }
 0x255   : > { %2015 = vmatprep.subr.msk.bf16.mxu1 %vm1388_vm3, %v1374_v50 }
 0x25c   : > { %1859 = vmatpush3.bf16.xpose.msra.mxu1 %v1453_v12 }
 0x25d   : > { %2016 = vmatprep.subr.msk.bf16.mxu1 %vm1388_vm3, %v1375_v57 }
 0x25f   : > { %v1382_v54 = vpop.permute.xlu0 %1381 }
 0x260   : > { %v1387_v14 = vrot.slane %v1382_v54, %v1386_v37 }
 0x264   : > { %1861 = vmatpush3.bf16.xpose.msra.mxu1 %v1456_v13 }
 0x265   : > { %2017 = vmatprep.subr.msk.bf16.mxu1 %vm1388_vm3, %v1376_v36 }
 0x26c   : > { %1863 = vmatpush3.bf16.xpose.msra.mxu1 %v1459_v9 }
 0x26d   : > { %2018 = vmatprep.subr.msk.bf16.mxu1 %vm1388_vm3, %v1377_v11 }
 0x274   : > { %1865 = vmatpush3.bf16.xpose.msra.mxu1 %v1462_v39 }
 0x27b   : > { %1867 = vmatmul.mubr.msk.bf16.vlgmr.msra.gmra.mrb[64].mxu1 %vm1388_vm3, %v2476_v10 }
 0x30e   : > { %v1522_v15 = vpop.f32.mrb[64].mxu0 }
 0x30f   : > { %v1523_v16 = vadd.f32 %v1522_v15, %v1387_v14  ;;  %v1524_v17 = vpop.f32.mrb[65].mxu0 }
 0x310   : > { %v1525_v7 = vadd.f32 %v1524_v17, %v1387_v14  ;;  %v1526_v18 = vpop.f32.mrb[66].mxu0 }
 0x311   : > { %v1570_v19 = vmax.f32 %v1523_v16, 0.0  ;;  %v1527_v24 = vpop.f32.mrb[67].mxu0 }
 0x312   : > { %v1571_v25 = vmax.f32 %v1525_v7, 0.0 }
 0x314   : > { %v1578_v35 = vcombine.low %v1570_v19, %v1571_v25 }
 0x316   : > { %v1586_v38 = vrot.slane %v1578_v35, %v1585_v29 }
 0x34e   : > { %v1563_v27 = vpop.f32.mrb[64].mxu1 }
 0x34f   : > { %v1564_v10 = vadd.f32 %v1563_v27, %v1387_v14  ;;  %v1565_v28 = vpop.f32.mrb[65].mxu1 }
 0x350   : > { %v1566_v30 = vadd.f32 %v1565_v28, %v1387_v14  ;;  %v1567_v31 = vpop.f32.mrb[66].mxu1 }
 0x351   : > { %v1572_v32 = vmax.f32 %v1564_v10, 0.0  ;;  %v1568_v33 = vpop.f32.mrb[67].mxu1 }
 0x352   : > { %v1573_v34 = vmax.f32 %v1566_v30, 0.0 }
 0x354   : > { %v1579_v40 = vcombine.low %v1572_v32, %v1573_v34 }
 0x356   : > { %v1593_v23 = vrot.slane %v1579_v40, %v1585_v29 }
 0x358   : > { %v1594_v41 = vcombine.low %v1586_v38, %v1593_v23 }
 0x35a   : > { %v1601_v51 = vrot.slane %v1594_v41, %v1585_v29 }
 0x35c   : > { %1607 = vst.msk [vmem:[%s274_s19] sm:$0xf] %vm1605_vm4, %v1601_v51 }
 0x35d   : > { %2076 = shalt.err (!%p2073_p3)
}
 0x35e   : > { %s2077_s16 = scalar_lea.hbm %s2603_s23, 64  ;;  %s2081_s15 = scalar_lea.hbm %s2652_s7, 128 }
 0x35f   : > { %p2078_p4 = scmp.ne.s32.totalorder %s2603_s23, %s2077_s16  ;;  %p2082_p9 = scmp.lt.u32.totalorder %s2603_s23, %s2652_s7 }
 0x360   : > { %p2083_p10 = scmp.lt.u32.totalorder %s2081_s15, %s2077_s16  ;;  %p2085_p12 = scmp.lt.u32.totalorder %s2077_s16, %s2603_s23 }
 0x361   : > { %p2079_p7 = pnand %p2078_p4, %p2208_p5 }
 0x362   : > { %p2084_p11 = por %p2083_p10, %p2082_p9 }
 0x363   : > { %p2080_p8 = pneg %p2079_p7 }
 0x364   : > { %p2086_p13 = por %p2085_p12, %p2084_p11 }
 0x366   : > { %p2087_p0 = pnand %p2086_p13, %p2080_p8 }
 0x368   : > { %2090 = shalt.err (!%p2087_p0)
}
 0x369   : > { %2019 = dma.vmem_to_hbm [thread:$0]  (%p2208_p5), %s2605_s20, 64, %s2603_s23, %s1609_s24  }
 0x36a PF: > { %p2025_p1 = scmp.ge.s32.totalorder %s2125_s29, 2  ;;  %s1635_s19 = sand.u32 1, %s2113_s26  }
 0x36b   : > { %s1636_s21 = scalar_lea.sflag [#allocation4], %s1635_s19 }
 0x36c   : > { %p2022_p2 = pnand %p2025_p1, %p2212_p6 }
 0x36e   : > { %2108 = dma.done.wait (!%p2022_p2), %s1636_s21, 64  }
 0x36f   : > { %2110 = vsyncadd (!%p2022_p2), %s1636_s21, 4294967232  ;;  %p19_p3 = scmp.ge.s32.totalorder %s2196_s8, 4   ;;  %s2655_s26 = smov %s2117_s27 }
 0x370   : > { %s2656_s27 = smov %s2121_s28  ;;  %s2657_s28 = smov %s2206_s11 }
 0x371   : > { %s2658_s29 = smov %s2196_s8  ;;  %21 = sbr.rel (!%p19_p3) target bundleno = 6 (0x6), region = 83 }
 0x378   :  { %1641 = vsyncpa [#allocation4], 1 }
 0x379   :  { %1643 = vsyncpa [#allocation4 + $0x1], 1 }

</bundles_post_ra>
